<compile_context>
chip_gen: v6e
topology: v6e:2x2x1
jax: 0.10.0
libtpu: 0.0.40
codegen_flags: <defaults>
</compile_context>

<pallas_src>
import jax
import jax.numpy as jnp
from jax import lax
from jax.experimental import pallas as pl
from jax.experimental.pallas import tpu as pltpu

_LANE = 128
_SUBLANE = 8

TILE_B_MAX = 32768                     # upper bound on rows per grid step (VMEM budget caps it further)
VMEM_BLOCK_BUDGET = 24 * 1024 * 1024   # budget for streamed + intermediate blocks of one grid step
VMEM_LIMIT_BYTES = 48 * 1024 * 1024    # > v5e's 16 MiB scoped default, < v7x's 64 MiB physical VMEM
MIN_BATCH_FOR_PALLAS = 512             # TODO(synk): re-benchmark the Pallas/XLA crossover per TPU generation.


def _round_up(n, m):
    return ((n + m - 1) // m) * m


def _streamed_bytes_per_row(noise_dim, cond_dim, hidden, output_dim):
    """Approximate VMEM bytes per batch row for one grid step (f32, (8,128) layout padding)."""
    inputs = (_round_up(noise_dim, _LANE) + _round_up(cond_dim, _LANE)) * 4 * 2   # double-buffered, lane-padded
    output = _round_up(output_dim, _SUBLANE) * 4 * 2                              # double-buffered, sublane-padded
    hidden_act = _round_up(hidden, _SUBLANE) * 4                                  # in-kernel hidden temp
    relayout = (_round_up(noise_dim, _SUBLANE) + _round_up(cond_dim, _SUBLANE)) * 4  # A.B^T operand relayouts
    return inputs + output + hidden_act + relayout


def _choose_tile_b(B, noise_dim, cond_dim, hidden, output_dim, tile_b_max):
    per_row = _streamed_bytes_per_row(noise_dim, cond_dim, hidden, output_dim)
    vmem_cap = max(_LANE, (VMEM_BLOCK_BUDGET // per_row) // _LANE * _LANE)
    cap = min(vmem_cap, max(_LANE, (tile_b_max // _LANE) * _LANE))
    # Pick the tile from the batch (not the batch from the tile) so padding waste in the
    # last block stays < 128 rows, and keep >= 2 grid steps once there is enough work to
    # split across v7x's two TensorCores.
    min_steps = 2 if B > 4096 else 1
    n_steps = max(min_steps, pl.cdiv(B, cap))
    return min(cap, _round_up(pl.cdiv(B, n_steps), _LANE))


def generator_kernel(z_ref, c_ref, w1z_ref, w1c_ref, b1_ref, w2_ref, b2_ref, out_ref):
    """One batch tile of: out = W2 @ relu(W1z @ z^T + W1c @ c^T + b1) + b2  (feature-major).

    z_ref:   [tile_b, noise_dim] f32  (streamed, batch-major)
    c_ref:   [tile_b, cond_dim]  f32  (streamed, batch-major)
    w1z_ref: [hidden, noise_dim] f32  (resident; PyTorch nn.Linear layout [out, in])
    w1c_ref: [hidden, cond_dim]  f32  (resident)
    b1_ref:  [hidden, 1]         f32  (resident; broadcasts over lanes)
    w2_ref:  [out_dim, hidden]   f32  (resident)
    b2_ref:  [out_dim, 1]        f32  (resident)
    out_ref: [out_dim, tile_b]   f32  (feature-major: batch rides the lane axis)
    """
    # Contract the small feature dims of the batch-major tiles (A.B^T, like q.k^T in
    # attention kernels) so hidden/output stay lane-dense with batch on lanes.
    dn = (((1,), (1,)), ((), ()))
    h = lax.dot_general(w1z_ref[...], z_ref[...], dn, preferred_element_type=jnp.float32)
    h = h + lax.dot_general(w1c_ref[...], c_ref[...], dn, preferred_element_type=jnp.float32)
    h = jnp.maximum(h + b1_ref[...], 0.0)                     # ReLU, [hidden, tile_b]
    out_ref[...] = (
        jnp.dot(w2_ref[...], h, preferred_element_type=jnp.float32) + b2_ref[...]
    )


def generator_forward_pallas(z, cond_info, params, *, tile_b_max=TILE_B_MAX,
                             feature_major_out=False):
    """z: [B, noise_dim], cond_info: [B, cond_dim] -> [B, output_dim] f32
    (or [output_dim, B] if feature_major_out=True, to let consumers skip the transpose)."""
    w1z, w1c, b1 = params["w1_z"], params["w1_c"], params["b1"]
    w2, b2 = params["w2"], params["b2"]
    B, noise_dim = z.shape
    cond_dim = cond_info.shape[1]
    hidden = w1z.shape[0]
    output_dim = w2.shape[0]

    tile_b = _choose_tile_b(B, noise_dim, cond_dim, hidden, output_dim, tile_b_max)
    grid = (pl.cdiv(B, tile_b),)   # last block is a masked boundary block; no jnp.pad copies

    out_fm = pl.pallas_call(
        generator_kernel,
        out_shape=jax.ShapeDtypeStruct((output_dim, B), jnp.float32),
        grid=grid,
        in_specs=[
            pl.BlockSpec((tile_b, noise_dim), lambda i: (i, 0)),    # streamed z tiles
            pl.BlockSpec((tile_b, cond_dim), lambda i: (i, 0)),     # streamed cond tiles
            pl.BlockSpec((hidden, noise_dim), lambda i: (0, 0)),    # resident weights / biases
            pl.BlockSpec((hidden, cond_dim), lambda i: (0, 0)),
            pl.BlockSpec((hidden, 1), lambda i: (0, 0)),
            pl.BlockSpec((output_dim, hidden), lambda i: (0, 0)),
            pl.BlockSpec((output_dim, 1), lambda i: (0, 0)),
        ],
        out_specs=pl.BlockSpec((output_dim, tile_b), lambda i: (0, i)),
        compiler_params=pltpu.CompilerParams(
            dimension_semantics=("parallel",),    # batch axis -> both TCs on v7x
            vmem_limit_bytes=VMEM_LIMIT_BYTES,
        ),
    )(z, cond_info, w1z, w1c, b1, w2, b2)

    if feature_major_out:
        return out_fm                    # [output_dim, B]
    return out_fm.T                      # [B, output_dim], matching the PyTorch module


def generator_reference(z, cond_info, params):
    """Plain-JAX mirror of the PyTorch forward: cat -> Linear(., 50) -> ReLU -> Linear(50, out)."""
    x = jnp.concatenate([z, cond_info], axis=1).astype(jnp.float32)
    w1 = jnp.concatenate([params["w1_z"], params["w1_c"]], axis=1)   # [hidden, noise+cond]
    h = jnp.maximum(x @ w1.T + params["b1"][:, 0], 0.0)
    return h @ params["w2"].T + params["b2"][:, 0]


_reference_jit = jax.jit(generator_reference)


def generator_forward(z, cond_info, params):
    """Dispatch: tiny batches go to plain XLA (fixed pallas_call overhead dominates there).
    Both paths are full f32, so results agree regardless of batch size."""
    if z.shape[0] >= MIN_BATCH_FOR_PALLAS:
        return generator_forward_pallas(z, cond_info, params)
    return _reference_jit(z, cond_info, params)


def init_generator_params(key, cond_dim, noise_dim, output_dim, hidden=50):
    """Parameters directly in the kernel's layout (PyTorch nn.Linear stores weight as [out, in]);
    W1 is pre-split into its z / cond column blocks and biases are [n, 1] columns, so no
    per-call transposes/reshapes are needed."""
    k1, k2, k3, k4 = jax.random.split(key, 4)
    in_dim = cond_dim + noise_dim
    w1 = jax.random.normal(k1, (hidden, in_dim), jnp.float32) * (1.0 / jnp.sqrt(in_dim))
    b1 = jax.random.normal(k2, (hidden, 1), jnp.float32) * 0.01
    w2 = jax.random.normal(k3, (output_dim, hidden), jnp.float32) * (1.0 / jnp.sqrt(hidden))
    b2 = jax.random.normal(k4, (output_dim, 1), jnp.float32) * 0.01
    return {
        "w1_z": w1[:, :noise_dim],   # cat([z, cond]) puts z first
        "w1_c": w1[:, noise_dim:],
        "b1": b1,
        "w2": w2,
        "b2": b2,
    }


if __name__ == "__main__":
    # Small shapes consistent with the module's forward.
    B, cond_dim, noise_dim, output_dim = 8, 6, 10, 4

    key = jax.random.PRNGKey(0)
    kz, kc, kp = jax.random.split(key, 3)

    def snap_bf16(t):
        # Snap test values onto the bf16 grid so the comparison is insensitive to the
        # backend's default f32-matmul precision: bf16-exact operands give identical
        # products on either path; only the f32 accumulation order differs.
        return t.astype(jnp.bfloat16).astype(jnp.float32)

    z = snap_bf16(jax.random.normal(kz, (B, noise_dim), jnp.float32))
    cond_info = snap_bf16(jax.random.normal(kc, (B, cond_dim), jnp.float32))
    params = jax.tree_util.tree_map(
        snap_bf16, init_generator_params(kp, cond_dim, noise_dim, output_dim))

    # Single-tile grid (B=8 -> one 128-row block with masked ragged edges).
    out = jax.block_until_ready(generator_forward_pallas(z, cond_info, params))
    ref = generator_reference(z, cond_info, params)
    assert out.shape == (B, output_dim)
    assert jnp.allclose(out, ref, atol=1e-4, rtol=1e-4), "mismatch vs reference (B=8)"

    # Multi-step grid + ragged last block (B=300 with forced 128-row tiles -> 3 steps).
    B2 = 300
    kz2, kc2 = jax.random.split(jax.random.PRNGKey(1))
    z2 = snap_bf16(jax.random.normal(kz2, (B2, noise_dim), jnp.float32))
    c2 = snap_bf16(jax.random.normal(kc2, (B2, cond_dim), jnp.float32))
    out2 = jax.block_until_ready(generator_forward_pallas(z2, c2, params, tile_b_max=128))
    ref2 = generator_reference(z2, c2, params)
    assert out2.shape == (B2, output_dim)
    assert jnp.allclose(out2, ref2, atol=1e-4, rtol=1e-4), "mismatch vs reference (B=300)"

    # Feature-major output path (lets downstream consumers skip the final transpose).
    out_fm = jax.block_until_ready(
        generator_forward_pallas(z, cond_info, params, feature_major_out=True))
    assert out_fm.shape == (output_dim, B)
    assert jnp.allclose(out_fm.T, ref, atol=1e-4, rtol=1e-4), "mismatch (feature-major)"

    print("KERNEL_OK")
</pallas_src>

<mosaic_0001>
module attributes {stable_mosaic.version = 11 : i64} {
  func.func @generator_kernel(%arg0: i32, %arg1: memref<128x10xf32, #tpu.memory_space<vmem>>, %arg2: memref<128x6xf32, #tpu.memory_space<vmem>>, %arg3: memref<50x10xf32, #tpu.memory_space<vmem>>, %arg4: memref<50x6xf32, #tpu.memory_space<vmem>>, %arg5: memref<50x1xf32, #tpu.memory_space<vmem>>, %arg6: memref<4x50xf32, #tpu.memory_space<vmem>>, %arg7: memref<4x1xf32, #tpu.memory_space<vmem>>, %arg8: memref<4x128xf32, #tpu.memory_space<vmem>>) attributes {dimension_semantics = [#tpu.dimension_semantics<parallel>], iteration_bounds = array<i64: 1>, scalar_prefetch = 0 : i64, scratch_operands = 0 : i64, tpu.core_type = #tpu.core_type<tc>, window_params = [{transform_indices = @transform_0, window_bounds = array<i64: 128, 10>}, {transform_indices = @transform_1, window_bounds = array<i64: 128, 6>}, {pipeline_mode = #tpu.pipeline_mode<synchronous>, transform_indices = @transform_2, window_bounds = array<i64: 50, 10>}, {pipeline_mode = #tpu.pipeline_mode<synchronous>, transform_indices = @transform_3, window_bounds = array<i64: 50, 6>}, {pipeline_mode = #tpu.pipeline_mode<synchronous>, transform_indices = @transform_4, window_bounds = array<i64: 50, 1>}, {pipeline_mode = #tpu.pipeline_mode<synchronous>, transform_indices = @transform_5, window_bounds = array<i64: 4, 50>}, {pipeline_mode = #tpu.pipeline_mode<synchronous>, transform_indices = @transform_6, window_bounds = array<i64: 4, 1>}, {transform_indices = @transform_7, window_bounds = array<i64: 4, 128>}]} {
    %c0 = arith.constant 0 : index
    %c0_0 = arith.constant 0 : index
    %0 = vector.load %arg3[%c0, %c0_0] : memref<50x10xf32, #tpu.memory_space<vmem>>, vector<50x10xf32>
    %c0_1 = arith.constant 0 : index
    %c0_2 = arith.constant 0 : index
    %1 = vector.load %arg1[%c0_1, %c0_2] : memref<128x10xf32, #tpu.memory_space<vmem>>, vector<128x10xf32>
    %cst = arith.constant dense<0.000000e+00> : vector<50x128xf32>
    %2 = tpu.matmul %0, %1, %cst {dimension_numbers = #tpu.dot_dimension_numbers<[1], [1], [0], [0], [0, 0, 1, 0], [], []>} : vector<50x10xf32>, vector<128x10xf32>, vector<50x128xf32> -> vector<50x128xf32>
    %c0_3 = arith.constant 0 : index
    %c0_4 = arith.constant 0 : index
    %3 = vector.load %arg4[%c0_3, %c0_4] : memref<50x6xf32, #tpu.memory_space<vmem>>, vector<50x6xf32>
    %c0_5 = arith.constant 0 : index
    %c0_6 = arith.constant 0 : index
    %4 = vector.load %arg2[%c0_5, %c0_6] : memref<128x6xf32, #tpu.memory_space<vmem>>, vector<128x6xf32>
    %cst_7 = arith.constant dense<0.000000e+00> : vector<50x128xf32>
    %5 = tpu.matmul %3, %4, %cst_7 {dimension_numbers = #tpu.dot_dimension_numbers<[1], [1], [0], [0], [0, 0, 1, 0], [], []>} : vector<50x6xf32>, vector<128x6xf32>, vector<50x128xf32> -> vector<50x128xf32>
    %6 = arith.addf %2, %5 : vector<50x128xf32>
    %c0_8 = arith.constant 0 : index
    %c0_9 = arith.constant 0 : index
    %7 = vector.load %arg5[%c0_8, %c0_9] : memref<50x1xf32, #tpu.memory_space<vmem>>, vector<50x1xf32>
    %8 = vector.broadcast %7 : vector<50x1xf32> to vector<50x128xf32>
    %9 = arith.addf %6, %8 : vector<50x128xf32>
    %cst_10 = arith.constant 0.000000e+00 : f32
    %10 = vector.broadcast %cst_10 : f32 to vector<50x128xf32>
    %11 = arith.maximumf %9, %10 : vector<50x128xf32>
    %c0_11 = arith.constant 0 : index
    %c0_12 = arith.constant 0 : index
    %12 = vector.load %arg6[%c0_11, %c0_12] : memref<4x50xf32, #tpu.memory_space<vmem>>, vector<4x50xf32>
    %cst_13 = arith.constant dense<0.000000e+00> : vector<4x128xf32>
    %13 = tpu.matmul %12, %11, %cst_13 {dimension_numbers = #tpu.dot_dimension_numbers<[1], [0], [0], [1], [0, 0, 1, 1], [], []>} : vector<4x50xf32>, vector<50x128xf32>, vector<4x128xf32> -> vector<4x128xf32>
    %c0_14 = arith.constant 0 : index
    %c0_15 = arith.constant 0 : index
    %14 = vector.load %arg7[%c0_14, %c0_15] : memref<4x1xf32, #tpu.memory_space<vmem>>, vector<4x1xf32>
    %15 = vector.broadcast %14 : vector<4x1xf32> to vector<4x128xf32>
    %16 = arith.addf %13, %15 : vector<4x128xf32>
    %c0_16 = arith.constant 0 : index
    %c0_17 = arith.constant 0 : index
    %17 = vector.load %arg8[%c0_16, %c0_17] : memref<4x128xf32, #tpu.memory_space<vmem>>, vector<4x128xf32>
    tpu.vector_store %arg8[%c0_16, %c0_17], %16 {strides = array<i32>} : memref<4x128xf32, #tpu.memory_space<vmem>>, vector<4x128xf32>,
    return
  }
  func.func @transform_0(%arg0: i32) -> (i32, i32) {
    %c0_i32 = arith.constant 0 : i32
    %c0_i32_0 = arith.constant 0 : i32
    return %arg0, %c0_i32 : i32, i32
  }
  func.func @transform_1(%arg0: i32) -> (i32, i32) {
    %c0_i32 = arith.constant 0 : i32
    %c0_i32_0 = arith.constant 0 : i32
    return %arg0, %c0_i32 : i32, i32
  }
  func.func @transform_2(%arg0: i32) -> (i32, i32) {
    %c0_i32 = arith.constant 0 : i32
    %c0_i32_0 = arith.constant 0 : i32
    %c0_i32_1 = arith.constant 0 : i32
    return %c0_i32, %c0_i32_0 : i32, i32
  }
  func.func @transform_3(%arg0: i32) -> (i32, i32) {
    %c0_i32 = arith.constant 0 : i32
    %c0_i32_0 = arith.constant 0 : i32
    %c0_i32_1 = arith.constant 0 : i32
    return %c0_i32, %c0_i32_0 : i32, i32
  }
  func.func @transform_4(%arg0: i32) -> (i32, i32) {
    %c0_i32 = arith.constant 0 : i32
    %c0_i32_0 = arith.constant 0 : i32
    %c0_i32_1 = arith.constant 0 : i32
    return %c0_i32, %c0_i32_0 : i32, i32
  }
  func.func @transform_5(%arg0: i32) -> (i32, i32) {
    %c0_i32 = arith.constant 0 : i32
    %c0_i32_0 = arith.constant 0 : i32
    %c0_i32_1 = arith.constant 0 : i32
    return %c0_i32, %c0_i32_0 : i32, i32
  }
  func.func @transform_6(%arg0: i32) -> (i32, i32) {
    %c0_i32 = arith.constant 0 : i32
    %c0_i32_0 = arith.constant 0 : i32
    %c0_i32_1 = arith.constant 0 : i32
    return %c0_i32, %c0_i32_0 : i32, i32
  }
  func.func @transform_7(%arg0: i32) -> (i32, i32) {
    %c0_i32 = arith.constant 0 : i32
    %c0_i32_0 = arith.constant 0 : i32
    return %c0_i32, %arg0 : i32, i32
  }
}

</mosaic_0001>

<bundles_post_ra>
// kernel: tpu_custom_call.1
= control target key start
LH: loop header
LB: loop body
LE: loop exit
PB: predicated region body
PF: predicated region fallthrough
CT: control target
= control target key end

     0   :  { %vm73_vm0 = vcmask 48128   ;;  %vm243_vm1 = vcmask 80896   ;;  %v822_v2 = vmov 0.0   ;;  %vm823_vm2 = vmmov 0   ;;  %s1149_s0 = inlined_call_operand.vmem [shape: f32[8,10], index: 0, kind: input, shape index: {}]   ;;  %s1150_s1 = inlined_call_operand.vmem [shape: f32[8,6], index: 1, kind: input, shape index: {}]   ;;  %s1151_s2 = inlined_call_operand.vmem [shape: f32[50,10], index: 2, kind: input, shape index: {}]   ;;  %s1152_s3 = inlined_call_operand.vmem [shape: f32[50,6], index: 3, kind: input, shape index: {}]   ;;  %s1153_s4 = inlined_call_operand.vmem [shape: f32[50,1], index: 4, kind: input, shape index: {}]   ;;  %s1154_s5 = inlined_call_operand.vmem [shape: f32[4,50], index: 5, kind: input, shape index: {}]   ;;  %s1155_s6 = inlined_call_operand.vmem [shape: f32[4,1], index: 6, kind: input, shape index: {}]   ;;  %s1156_s7 = inlined_call_operand.hbm [shape: f32[4,8], index: 7, kind: output, shape index: {}]  }
   0x1   :  { %v72_v0 = vld [vmem:[%s1150_s1 + $0x78] sm:$0xff]  ;;  %671 = vmatprep.subr.mxu0 %v822_v2  ;;  %724 = vmatprep.subr.mxu1 %v822_v2  ;;  %v71_v3 = vld [vmem:[%s1150_s1 + $0x70] sm:$0xff]  ;;  %v824_v5 = vmov 0   ;;  %v70_v6 = vld [vmem:[%s1150_s1 + $0x68] sm:$0xff] }
   0x2   :  { %v49_v1 = vld [vmem:[%s1149_s0 + $0x78] sm:$0xff]  ;;  %672 = vmatpush3.xpose.msk.msra.mxu0 %vm73_vm0, %v72_v0  ;;  %v48_v4 = vld [vmem:[%s1149_s0 + $0x70] sm:$0xff]  ;;  %703 = vmatprep.mubr.msk.f32.mxu0 %vm823_vm2, %v822_v2  ;;  %v47_v7 = vld [vmem:[%s1149_s0 + $0x68] sm:$0xff] }
   0x3   :  { %725 = vmatpush3.xpose.msk.msra.mxu1 %vm243_vm1, %v49_v1  ;;  %673 = vmatprep.subr.mxu0 %v822_v2  ;;  %v69_v8 = vld [vmem:[%s1150_s1 + $0x60] sm:$0xff]  ;;  %v68_v10 = vld [vmem:[%s1150_s1 + $0x58] sm:$0xff]  ;;  %v419_v12 = vld [vmem:[%s1153_s4 + $0x30] sm:$0x3] }
   0x4   :  { %726 = vmatprep.subr.mxu1 %v822_v2  ;;  %756 = vmatprep.mubr.msk.f32.mxu1 %vm823_vm2, %v822_v2  ;;  %v46_v9 = vld [vmem:[%s1149_s0 + $0x60] sm:$0xff]  ;;  %v45_v11 = vld [vmem:[%s1149_s0 + $0x58] sm:$0xff]  ;;  %v418_v14 = vld [vmem:[%s1153_s4 + $0x28] sm:$0xff] }
   0x5   :  { %798 = vset.pattern.permute.xlu0 %v824_v5  ;;  %799 = vset.pattern.permute.xlu1 %v824_v5  ;;  %v417_v13 = vld [vmem:[%s1153_s4 + $0x20] sm:$0xff]  ;;  %v416_v15 = vld [vmem:[%s1153_s4 + $0x18] sm:$0xff] }
   0x6   :  { %674 = vmatpush3.xpose.msk.msra.mxu0 %vm73_vm0, %v71_v3  ;;  %452 = vperm.xlu0 %798, %v419_v12  }
   0x7   :  { %727 = vmatpush3.xpose.msk.msra.mxu1 %vm243_vm1, %v48_v4  ;;  %675 = vmatprep.subr.mxu0 %v822_v2 }
   0x8   :  { %728 = vmatprep.subr.mxu1 %v822_v2  ;;  %442 = vperm.xlu1 %799, %v417_v13  }
   0xa   :  { %676 = vmatpush3.xpose.msk.msra.mxu0 %vm73_vm0, %v70_v6 }
   0xb   :  { %729 = vmatpush3.xpose.msk.msra.mxu1 %vm243_vm1, %v47_v7  ;;  %677 = vmatprep.subr.mxu0 %v822_v2 }
   0xc   :  { %730 = vmatprep.subr.mxu1 %v822_v2 }
   0xe   :  { %678 = vmatpush3.xpose.msk.msra.mxu0 %vm73_vm0, %v69_v8 }
   0xf   :  { %731 = vmatpush3.xpose.msk.msra.mxu1 %vm243_vm1, %v46_v9  ;;  %679 = vmatprep.subr.mxu0 %v822_v2 }
  0x10   :  { %732 = vmatprep.subr.mxu1 %v822_v2 }
  0x12   :  { %680 = vmatpush3.xpose.msk.msra.mxu0 %vm73_vm0, %v68_v10 }
  0x13   :  { %733 = vmatpush3.xpose.msk.msra.mxu1 %vm243_vm1, %v45_v11 }
  0x14   :  { %12 = vsyncpa [#allocation3], 0  ;;  %681 = vmatprep.subr.mxu0 %v822_v2  ;;  %734 = vmatprep.subr.mxu1 %v822_v2  ;;  %v67_v16 = vld [vmem:[%s1150_s1 + $0x50] sm:$0xff]  ;;  %v414_v19 = vld [vmem:[%s1153_s4 + $0x8] sm:$0xff]  ;;  %vm480_vm3 = vcmask 1041408   ;;  %vm476_vm4 = vcmask 408576  }
  0x15   :  { %v44_v17 = vld [vmem:[%s1149_s0 + $0x50] sm:$0xff]  ;;  %447 = vperm.xlu0 %798, %v418_v14   ;;  %437 = vperm.xlu1 %799, %v416_v15   ;;  %v66_v20 = vld [vmem:[%s1150_s1 + $0x48] sm:$0xff]  ;;  %v413_v22 = vld [vmem:[%s1153_s4] sm:$0xff]  ;;  %s825_s9 = smov [#allocation2]  }
  0x16   :  { %v415_v18 = vld [vmem:[%s1153_s4 + $0x10] sm:$0xff]  ;;  %682 = vmatpush3.xpose.msk.msra.mxu0 %vm73_vm0, %v67_v16  ;;  %v43_v21 = vld [vmem:[%s1149_s0 + $0x48] sm:$0xff]  ;;  %v470_v23 = vld [vmem:[%s1155_s6] sm:$0xf]  ;;  %s561_s10 = sshll.u32 %s825_s9, 4  ;;  %s562_s10 = int_to_ptr.vmem [resolvable:$true] %s561_s10 }
  0x17   :  { %735 = vmatpush3.xpose.msk.msra.mxu1 %vm243_vm1, %v44_v17  ;;  %683 = vmatprep.subr.mxu0 %v822_v2  ;;  %v65_v24 = vld [vmem:[%s1150_s1 + $0x40] sm:$0xff]  ;;  %v64_v26 = vld [vmem:[%s1150_s1 + $0x38] sm:$0xff]  ;;  %v63_v28 = vld [vmem:[%s1150_s1 + $0x30] sm:$0xff]  ;;  %s800_s11 = scalar_lea.vmem %s562_s10, 64  ;;  %p805_p1 = scmp.lt.s32.totalorder %s562_s10, %s562_s10 }
  0x18   :  { %736 = vmatprep.subr.mxu1 %v822_v2  ;;  %v42_v25 = vld [vmem:[%s1149_s0 + $0x40] sm:$0xff]  ;;  %v41_v27 = vld [vmem:[%s1149_s0 + $0x38] sm:$0xff]  ;;  %v40_v29 = vld [vmem:[%s1149_s0 + $0x30] sm:$0xff]  ;;  %p801_p0 = scmp.ne.s32.totalorder %s562_s10, %s800_s11  ;;  %p806_p2 = scmp.lt.s32.totalorder %s800_s11, %s800_s11 }
  0x19   :  { %432 = vperm.xlu0 %798, %v415_v18   ;;  %427 = vperm.xlu1 %799, %v414_v19   ;;  %v62_v30 = vld [vmem:[%s1150_s1 + $0x28] sm:$0xff]  ;;  %v61_v32 = vld [vmem:[%s1150_s1 + $0x20] sm:$0xff]  ;;  %v60_v34 = vld [vmem:[%s1150_s1 + $0x18] sm:$0xff] }
  0x1a   :  { %684 = vmatpush3.xpose.msk.msra.mxu0 %vm73_vm0, %v66_v20  ;;  %v39_v31 = vld [vmem:[%s1149_s0 + $0x28] sm:$0xff]  ;;  %v38_v33 = vld [vmem:[%s1149_s0 + $0x20] sm:$0xff]  ;;  %v37_v35 = vld [vmem:[%s1149_s0 + $0x18] sm:$0xff]  ;;  %p807_p3 = por %p806_p2, %p805_p1 }
  0x1b   :  { %737 = vmatpush3.xpose.msk.msra.mxu1 %vm243_vm1, %v43_v21  ;;  %685 = vmatprep.subr.mxu0 %v822_v2  ;;  %v59_v36 = vld [vmem:[%s1150_s1 + $0x10] sm:$0xff]  ;;  %v58_v38 = vld [vmem:[%s1150_s1 + $0x8] sm:$0xff]  ;;  %v57_v40 = vld [vmem:[%s1150_s1] sm:$0xff] }
  0x1c   :  { %738 = vmatprep.subr.mxu1 %v822_v2  ;;  %v36_v37 = vld [vmem:[%s1149_s0 + $0x10] sm:$0xff]  ;;  %v35_v39 = vld [vmem:[%s1149_s0 + $0x8] sm:$0xff]  ;;  %v34_v41 = vld [vmem:[%s1149_s0] sm:$0xff]  ;;  %p808_p4 = pnand %p807_p3, %p801_p0 }
  0x1d   :  { %422 = vperm.xlu0 %798, %v413_v22   ;;  %473 = vperm.xlu1 %799, %v470_v23   ;;  %v50_v42 = vld [vmem:[%s1152_s3] sm:$0xff]  ;;  %v51_v44 = vld [vmem:[%s1152_s3 + $0x8] sm:$0xff]  ;;  %v52_v46 = vld [vmem:[%s1152_s3 + $0x10] sm:$0xff] }
  0x1e   :  { %686 = vmatpush3.xpose.msk.msra.mxu0 %vm73_vm0, %v65_v24  ;;  %v27_v43 = vld [vmem:[%s1151_s2] sm:$0xff]  ;;  %v28_v45 = vld [vmem:[%s1151_s2 + $0x8] sm:$0xff]  ;;  %v29_v47 = vld [vmem:[%s1151_s2 + $0x10] sm:$0xff] }
  0x1f   :  { %739 = vmatpush3.xpose.msk.msra.mxu1 %vm243_vm1, %v42_v25  ;;  %687 = vmatprep.subr.mxu0 %v822_v2  ;;  %v53_v48 = vld [vmem:[%s1152_s3 + $0x18] sm:$0xff]  ;;  %v54_v50 = vld [vmem:[%s1152_s3 + $0x20] sm:$0xff]  ;;  %v55_v52 = vld [vmem:[%s1152_s3 + $0x28] sm:$0xff] }
  0x20   :  { %740 = vmatprep.subr.mxu1 %v822_v2  ;;  %v30_v49 = vld [vmem:[%s1151_s2 + $0x18] sm:$0xff]  ;;  %v31_v51 = vld [vmem:[%s1151_s2 + $0x20] sm:$0xff]  ;;  %v32_v53 = vld [vmem:[%s1151_s2 + $0x28] sm:$0xff] }
  0x21   :  { %v56_v54 = vld [vmem:[%s1152_s3 + $0x30] sm:$0x3] }
  0x22   :  { %688 = vmatpush3.xpose.msk.msra.mxu0 %vm73_vm0, %v64_v26  ;;  %v33_v55 = vld [vmem:[%s1151_s2 + $0x30] sm:$0x3] }
  0x23   :  { %741 = vmatpush3.xpose.msk.msra.mxu1 %vm243_vm1, %v41_v27  ;;  %689 = vmatprep.subr.mxu0 %v822_v2 }
  0x24   :  { %742 = vmatprep.subr.mxu1 %v822_v2 }
  0x26   :  { %690 = vmatpush3.xpose.msk.msra.mxu0 %vm73_vm0, %v63_v28 }
  0x27   :  { %743 = vmatpush3.xpose.msk.msra.mxu1 %vm243_vm1, %v40_v29  ;;  %691 = vmatprep.subr.mxu0 %v822_v2 }
  0x28   :  { %744 = vmatprep.subr.mxu1 %v822_v2 }
  0x2a   :  { %692 = vmatpush3.xpose.msk.msra.mxu0 %vm73_vm0, %v62_v30 }
  0x2b   :  { %745 = vmatpush3.xpose.msk.msra.mxu1 %vm243_vm1, %v39_v31  ;;  %693 = vmatprep.subr.mxu0 %v822_v2 }
  0x2c   :  { %746 = vmatprep.subr.mxu1 %v822_v2 }
  0x2e   :  { %694 = vmatpush3.xpose.msk.msra.mxu0 %vm73_vm0, %v61_v32 }
  0x2f   :  { %747 = vmatpush3.xpose.msk.msra.mxu1 %vm243_vm1, %v38_v33  ;;  %695 = vmatprep.subr.mxu0 %v822_v2 }
  0x30   :  { %748 = vmatprep.subr.mxu1 %v822_v2 }
  0x32   :  { %696 = vmatpush3.xpose.msk.msra.mxu0 %vm73_vm0, %v60_v34 }
  0x33   :  { %749 = vmatpush3.xpose.msk.msra.mxu1 %vm243_vm1, %v37_v35  ;;  %697 = vmatprep.subr.mxu0 %v822_v2 }
  0x34   :  { %750 = vmatprep.subr.mxu1 %v822_v2 }
  0x36   :  { %698 = vmatpush3.xpose.msk.msra.mxu0 %vm73_vm0, %v59_v36 }
  0x37   :  { %751 = vmatpush3.xpose.msk.msra.mxu1 %vm243_vm1, %v36_v37  ;;  %699 = vmatprep.subr.mxu0 %v822_v2 }
  0x38   :  { %752 = vmatprep.subr.mxu1 %v822_v2 }
  0x3a   :  { %700 = vmatpush3.xpose.msk.msra.mxu0 %vm73_vm0, %v58_v38 }
  0x3b   :  { %753 = vmatpush3.xpose.msk.msra.mxu1 %vm243_vm1, %v35_v39  ;;  %701 = vmatprep.subr.mxu0 %v822_v2 }
  0x3c   :  { %754 = vmatprep.subr.mxu1 %v822_v2 }
  0x3e   :  { %702 = vmatpush3.xpose.msk.msra.mxu0 %vm73_vm0, %v57_v40 }
  0x3f   :  { %755 = vmatpush3.xpose.msk.msra.mxu1 %vm243_vm1, %v34_v41  ;;  %777 = vmatprep.subr.mxu0 %v822_v2 }
  0x41   :  { %704 = vmatmul.mubr.msk.f32.vlgmr.msra.gmra.mxu0 %vm73_vm0, %v50_v42 }
  0x42   :  { %757 = vmatmul.mubr.msk.f32.vlgmr.msra.gmra.mxu1 %vm243_vm1, %v27_v43  ;;  %706 = vmatprep.mubr.msk.f32.mxu0 %vm823_vm2, %v822_v2 }
  0x43   :  { %759 = vmatprep.mubr.msk.f32.mxu1 %vm823_vm2, %v822_v2 }
  0x45   :  { %707 = vmatmul.mubr.msk.f32.gmra.mxu0 %vm73_vm0, %v51_v44 }
  0x46   :  { %760 = vmatmul.mubr.msk.f32.gmra.mxu1 %vm243_vm1, %v28_v45  ;;  %709 = vmatprep.mubr.msk.f32.mxu0 %vm823_vm2, %v822_v2 }
  0x47   :  { %762 = vmatprep.mubr.msk.f32.mxu1 %vm823_vm2, %v822_v2 }
  0x49   :  { %710 = vmatmul.mubr.msk.f32.gmra.mxu0 %vm73_vm0, %v52_v46 }
  0x4a   :  { %763 = vmatmul.mubr.msk.f32.gmra.mxu1 %vm243_vm1, %v29_v47  ;;  %712 = vmatprep.mubr.msk.f32.mxu0 %vm823_vm2, %v822_v2 }
  0x4b   :  { %765 = vmatprep.mubr.msk.f32.mxu1 %vm823_vm2, %v822_v2 }
  0x4d   :  { %713 = vmatmul.mubr.msk.f32.gmra.mxu0 %vm73_vm0, %v53_v48 }
  0x4e   :  { %766 = vmatmul.mubr.msk.f32.gmra.mxu1 %vm243_vm1, %v30_v49  ;;  %715 = vmatprep.mubr.msk.f32.mxu0 %vm823_vm2, %v822_v2  ;;  %v469_v49 = vld [vmem:[%s1154_s5] sm:$0xf] }
  0x4f   :  { %768 = vmatprep.mubr.msk.f32.mxu1 %vm823_vm2, %v822_v2 }
  0x51   :  { %716 = vmatmul.mubr.msk.f32.gmra.mxu0 %vm73_vm0, %v54_v50 }
  0x52   :  { %769 = vmatmul.mubr.msk.f32.gmra.mxu1 %vm243_vm1, %v31_v51  ;;  %718 = vmatprep.mubr.msk.f32.mxu0 %vm823_vm2, %v822_v2 }
  0x53   :  { %771 = vmatprep.mubr.msk.f32.mxu1 %vm823_vm2, %v822_v2 }
  0x55   :  { %719 = vmatmul.mubr.msk.f32.gmra.mxu0 %vm73_vm0, %v55_v52 }
  0x56   :  { %772 = vmatmul.mubr.msk.f32.gmra.mxu1 %vm243_vm1, %v32_v53  ;;  %721 = vmatprep.mubr.msk.f32.mxu0 %vm823_vm2, %v822_v2 }
  0x57   :  { %774 = vmatprep.mubr.msk.f32.mxu1 %vm823_vm2, %v822_v2 }
  0x59   :  { %722 = vmatmul.mubr.msk.f32.gmra.mxu0 %vm73_vm0, %v56_v54 }
  0x5a   :  { %775 = vmatmul.mubr.msk.f32.gmra.mxu1 %vm243_vm1, %v33_v55  ;;  %791 = vmatprep.mubr.msk.f32.mxu0 %vm823_vm2, %v822_v2 }
  0x81   :  { %v453_v9 = vpop.permute.xlu0 %452 }
  0x83   :  { %v443_v14 = vpop.permute.xlu1 %442 }
  0x90   :  { %v448_v17 = vpop.permute.xlu0 %447  ;;  %v438_v23 = vpop.permute.xlu1 %437 }
  0x94   :  { %v433_v31 = vpop.permute.xlu0 %432  ;;  %v428_v38 = vpop.permute.xlu1 %427 }
  0x98   :  { %v423_v42 = vpop.permute.xlu0 %422  ;;  %v474_v50 = vpop.permute.xlu1 %473 }
 0x101   :  { %v209_v56 = vpop.f32.mrf.mxu0 }
 0x102   :  { %v379_v57 = vpop.f32.mrf.mxu1 }
 0x103   :  { %v705_v58 = vpop.f32.mrf.mxu0  ;;  %v380_v39 = vadd.f32 %v379_v57, %v209_v56 }
 0x104   :  { %v758_v59 = vpop.f32.mrf.mxu1 }
 0x105   :  { %v214_v60 = vpop.f32.mrf.mxu0  ;;  %v455_v45 = vadd.f32 %v423_v42, %v380_v39 }
 0x106   :  { %v384_v61 = vpop.f32.mrf.mxu1 }
 0x107   :  { %v708_v62 = vpop.f32.mrf.mxu0  ;;  %v385_v35 = vadd.f32 %v384_v61, %v214_v60  ;;  %v462_v48 = vmax.f32 %v455_v45, 0.0 }
 0x108   :  { %v761_v63 = vpop.f32.mrf.mxu1 }
 0x109   :  { %v219_v0 = vpop.f32.mrf.mxu0  ;;  %v456_v43 = vadd.f32 %v428_v38, %v385_v35 }
 0x10a   :  { %v389_v1 = vpop.f32.mrf.mxu1 }
 0x10b   :  { %v711_v3 = vpop.f32.mrf.mxu0  ;;  %v390_v32 = vadd.f32 %v389_v1, %v219_v0  ;;  %v463_v47 = vmax.f32 %v456_v43, 0.0 }
 0x10c   :  { %v764_v4 = vpop.f32.mrf.mxu1 }
 0x10d   :  { %v224_v5 = vpop.f32.mrf.mxu0  ;;  %v457_v40 = vadd.f32 %v433_v31, %v390_v32 }
 0x10e   :  { %v394_v6 = vpop.f32.mrf.mxu1 }
 0x10f   :  { %v714_v7 = vpop.f32.mrf.mxu0  ;;  %v395_v28 = vadd.f32 %v394_v6, %v224_v5  ;;  %v464_v46 = vmax.f32 %v457_v40, 0.0 }
 0x110   :  { %v767_v8 = vpop.f32.mrf.mxu1 }
 0x111   :  { %v229_v10 = vpop.f32.mrf.mxu0  ;;  %v458_v36 = vadd.f32 %v438_v23, %v395_v28 }
 0x112   :  { %v399_v11 = vpop.f32.mrf.mxu1 }
 0x113   :  { %v717_v12 = vpop.f32.mrf.mxu0  ;;  %v400_v24 = vadd.f32 %v399_v11, %v229_v10  ;;  %v465_v44 = vmax.f32 %v458_v36, 0.0 }
 0x114   :  { %v770_v13 = vpop.f32.mrf.mxu1 }
 0x115   :  { %v234_v15 = vpop.f32.mrf.mxu0  ;;  %v459_v33 = vadd.f32 %v443_v14, %v400_v24 }
 0x116   :  { %v404_v16 = vpop.f32.mrf.mxu1 }
 0x117   :  { %v720_v18 = vpop.f32.mrf.mxu0  ;;  %v405_v20 = vadd.f32 %v404_v16, %v234_v15  ;;  %v466_v41 = vmax.f32 %v459_v33, 0.0 }
 0x118   :  { %v773_v19 = vpop.f32.mrf.mxu1 }
 0x119   :  { %v239_v21 = vpop.f32.mrf.mxu0  ;;  %v460_v29 = vadd.f32 %v448_v17, %v405_v20 }
 0x11a   :  { %v409_v22 = vpop.f32.mrf.mxu1 }
 0x11b   :  { %v410_v25 = vadd.f32 %v409_v22, %v239_v21  ;;  %v723_v26 = vpop.f32.mrf.mxu0  ;;  %v467_v37 = vmax.f32 %v460_v29, 0.0 }
 0x11c   :  { %v776_v27 = vpop.f32.mrf.mxu1 }
 0x11d   :  { %v461_v30 = vadd.f32 %v453_v9, %v410_v25 }
 0x11f   :  { %v468_v34 = vmax.f32 %v461_v30, 0.0 }
 0x121   :  { %778 = vmatpush3.msk.msra.mxu0 %vm480_vm3, %v468_v34 }
 0x122   :  { %779 = vmatprep.subr.mxu0 %v822_v2 }
 0x123   :  { %780 = vmatpush3.msra.mxu0 %v467_v37 }
 0x124   :  { %781 = vmatprep.subr.mxu0 %v822_v2 }
 0x125   :  { %782 = vmatpush3.msra.mxu0 %v466_v41 }
 0x126   :  { %783 = vmatprep.subr.mxu0 %v822_v2 }
 0x127   :  { %784 = vmatpush3.msra.mxu0 %v465_v44 }
 0x128   :  { %785 = vmatprep.subr.mxu0 %v822_v2 }
 0x129   :  { %786 = vmatpush3.msra.mxu0 %v464_v46 }
 0x12a   :  { %787 = vmatprep.subr.mxu0 %v822_v2 }
 0x12b   :  { %788 = vmatpush3.msra.mxu0 %v463_v47 }
 0x12c   :  { %789 = vmatprep.subr.mxu0 %v822_v2 }
 0x12d   :  { %790 = vmatpush3.msra.mxu0 %v462_v48 }
 0x12e   :  { %792 = vmatmul.mubr.msk.f32.vlgmr.msra.gmra.mxu0 %vm476_vm4, %v469_v49 }
 0x1ee   :  { %v550_v51 = vpop.f32.mrf.mxu0 }
 0x1ef   :  { %v551_v52 = vadd.f32 %v550_v51, %v474_v50 }
 0x1f0   :  { %v793_v53 = vpop.f32.mrf.mxu0 }
 0x1f1   :  { %554 = vst [vmem:[#allocation2] sm:$0xf] %v551_v52 }
 0x1f2   :  { %811 = shalt.err (!%p808_p4)
}
 0x1f3   :  { %564 = dma.vmem_to_hbm [thread:$0]  %s562_s10, 64, %s1156_s7, [#allocation3]  }
 0x1f4   :  { %820 = dma.done.wait [#allocation3], 64  }
 0x1f5   :  { %821 = vsyncadd [#allocation3], 4294967232 }
 0x1f6   :  { %568 = vsyncpa [#allocation3], 1 }

</bundles_post_ra>
